<compile_context>
chip_gen: v5e
topology: v5e:2x2
jax: 0.10.0
libtpu: 0.0.40
codegen_flags: <defaults>
</compile_context>

<pallas_src>
import functools
import math

import jax
import jax.numpy as jnp
from jax.experimental import pallas as pl
from jax.experimental.pallas import tpu as pltpu

_LANE = 128      # hidden / class dims padded to the TPU lane width
_K_TILE = 512    # feature-dimension tile (lane-dense, multiple of 128)


def _round_up(x, m):
    return (x + m - 1) // m * m


def _pad_batch(b):
    bp = _round_up(b, 16)            # bf16 sublane-packing friendly minimum
    return bp if bp <= 128 else _round_up(b, 128)


# ----------------------------------------------------------------------------------
# Fused MLP forward kernel:  logits = relu(x @ w1 + b1) @ w2 + b2   (+ pre-relu hidden)
# ----------------------------------------------------------------------------------
def _mlp_fwd_kernel(x_ref, w1_ref, b1_ref, w2_ref, b2_ref, o_ref, h_ref, acc_ref):
    k = pl.program_id(1)

    @pl.when(k == 0)
    def _():
        acc_ref[...] = jnp.zeros_like(acc_ref)

    acc_ref[...] += jnp.dot(x_ref[...], w1_ref[...], preferred_element_type=jnp.float32)

    @pl.when(k == pl.num_programs(1) - 1)
    def _():
        h_pre = acc_ref[...] + b1_ref[...]                    # [TM, Hp] f32
        h_ref[...] = h_pre                                     # residual for backward
        h = jnp.maximum(h_pre, 0.0).astype(w2_ref.dtype)       # bf16 for the MXU
        o_ref[...] = (jnp.dot(h, w2_ref[...], preferred_element_type=jnp.float32)
                      + b2_ref[...])


def mlp_fwd_pallas(xp, w1p, b1p, w2p, b2p):
    """Fused padded MLP forward.  Returns (logits_pad[f32], h_pre_pad[f32])."""
    Bp, Dp = xp.shape
    Hp = w1p.shape[1]
    Cp = w2p.shape[1]
    TM = min(Bp, 128)
    TK = _K_TILE
    grid = (Bp // TM, Dp // TK)
    xb = xp.astype(jnp.bfloat16)                              # bf16 operands, f32 acc
    return pl.pallas_call(
        _mlp_fwd_kernel,
        out_shape=(jax.ShapeDtypeStruct((Bp, Cp), jnp.float32),
                   jax.ShapeDtypeStruct((Bp, Hp), jnp.float32)),
        grid=grid,
        in_specs=[
            pl.BlockSpec((TM, TK), lambda m, k: (m, k)),      # x tile
            pl.BlockSpec((TK, Hp), lambda m, k: (k, 0)),      # w1 tile
            pl.BlockSpec((1, Hp), lambda m, k: (0, 0)),       # b1
            pl.BlockSpec((Hp, Cp), lambda m, k: (0, 0)),      # w2 (small, resident)
            pl.BlockSpec((1, Cp), lambda m, k: (0, 0)),       # b2
        ],
        out_specs=[
            pl.BlockSpec((TM, Cp), lambda m, k: (m, 0)),      # logits (lane-dense 128)
            pl.BlockSpec((TM, Hp), lambda m, k: (m, 0)),      # pre-relu hidden
        ],
        scratch_shapes=[pltpu.VMEM((TM, Hp), jnp.float32)],   # f32 accumulator
        compiler_params=pltpu.CompilerParams(
            dimension_semantics=("parallel", "arbitrary")),
    )(xb, w1p, b1p, w2p, b2p)


# ----------------------------------------------------------------------------------
# Fused MLP backward kernel (d/dx only):  dx = ((g @ w2^T) * relu'(h_pre)) @ w1^T
# Transposes expressed via dot_general contraction dims -> no HBM transpose copies.
# ----------------------------------------------------------------------------------
def _mlp_bwd_kernel(g_ref, w2_ref, h_ref, w1_ref, dx_ref):
    gh = jax.lax.dot_general(
        g_ref[...].astype(jnp.bfloat16), w2_ref[...],
        dimension_numbers=(((1,), (1,)), ((), ())),           # g @ w2^T
        preferred_element_type=jnp.float32)                   # [TM, Hp]
    gh = jnp.where(h_ref[...] > 0.0, gh, 0.0).astype(jnp.bfloat16)
    dx_ref[...] = jax.lax.dot_general(
        gh, w1_ref[...],
        dimension_numbers=(((1,), (1,)), ((), ())),           # gh @ w1_tile^T
        preferred_element_type=jnp.float32)                   # [TM, TK]


def mlp_bwd_pallas(g, w2p, h_pre, w1p):
    Bp, Cp = g.shape
    Hp = w2p.shape[0]
    Dp = w1p.shape[0]
    TM = min(Bp, 128)
    TK = _K_TILE
    grid = (Bp // TM, Dp // TK)                               # both axes independent
    return pl.pallas_call(
        _mlp_bwd_kernel,
        out_shape=jax.ShapeDtypeStruct((Bp, Dp), jnp.float32),
        grid=grid,
        in_specs=[
            pl.BlockSpec((TM, Cp), lambda m, k: (m, 0)),      # logits cotangent
            pl.BlockSpec((Hp, Cp), lambda m, k: (0, 0)),      # w2
            pl.BlockSpec((TM, Hp), lambda m, k: (m, 0)),      # pre-relu hidden
            pl.BlockSpec((TK, Hp), lambda m, k: (k, 0)),      # w1 tile
        ],
        out_specs=pl.BlockSpec((TM, TK), lambda m, k: (m, k)),  # lane-dense 512 tile
        compiler_params=pltpu.CompilerParams(
            dimension_semantics=("parallel", "parallel")),
    )(g, w2p, h_pre, w1p)


# ----------------------------------------------------------------------------------
# custom_vjp around the fused MLP (pallas_call has no autodiff rule)
# ----------------------------------------------------------------------------------
@jax.custom_vjp
def _mlp_logits_padded(xp, w1p, b1p, w2p, b2p):
    logits, _ = mlp_fwd_pallas(xp, w1p, b1p, w2p, b2p)
    return logits


def _mlp_logits_fwd(xp, w1p, b1p, w2p, b2p):
    logits, h_pre = mlp_fwd_pallas(xp, w1p, b1p, w2p, b2p)
    return logits, (h_pre, w1p, b1p, w2p, b2p)


def _mlp_logits_bwd(res, g):
    h_pre, w1p, b1p, w2p, b2p = res
    dx = mlp_bwd_pallas(g, w2p, h_pre, w1p)
    # TODO(synk): the attack only differentiates w.r.t. x; parameter cotangents are
    # returned as zeros (DCE'd under jit) instead of being computed.
    return (dx, jnp.zeros_like(w1p), jnp.zeros_like(b1p),
            jnp.zeros_like(w2p), jnp.zeros_like(b2p))


_mlp_logits_padded.defvjp(_mlp_logits_fwd, _mlp_logits_bwd)


def _mlp_logits(pp, xf_dpad, num_classes):
    """xf_dpad: [B, Dp] f32 (feature dim already zero-padded).  Returns [B, num_classes]."""
    B = xf_dpad.shape[0]
    Bp = _pad_batch(B)
    xp = jnp.pad(xf_dpad, ((0, Bp - B), (0, 0)))
    logits = _mlp_logits_padded(xp, pp["w1"], pp["b1"], pp["w2"], pp["b2"])
    return logits[:B, :num_classes]


# ----------------------------------------------------------------------------------
# PGD step kernel: x_adv = clamp(proj_eps(x + step*sign(g)), -1, 1)   (in-place aliased)
# ----------------------------------------------------------------------------------
def _pgd_kernel(x_ref, g_ref, org_ref, o_ref, *, step_size, epsilon):
    x_adv = x_ref[...] + step_size * jnp.sign(g_ref[...])
    x_adv = jnp.minimum(jnp.maximum(x_adv, org_ref[...] - epsilon), org_ref[...] + epsilon)
    o_ref[...] = jnp.minimum(jnp.maximum(x_adv, -1.0), 1.0)


def pgd_step_pallas(x, g, org, step_size, epsilon):
    B, Dp = x.shape
    TK = _K_TILE
    grid = (Dp // TK,)
    return pl.pallas_call(
        functools.partial(_pgd_kernel, step_size=float(step_size), epsilon=float(epsilon)),
        out_shape=jax.ShapeDtypeStruct((B, Dp), jnp.float32),
        grid=grid,
        in_specs=[
            pl.BlockSpec((B, TK), lambda k: (0, k)),
            pl.BlockSpec((B, TK), lambda k: (0, k)),
            pl.BlockSpec((B, TK), lambda k: (0, k)),
        ],
        out_specs=pl.BlockSpec((B, TK), lambda k: (0, k)),
        input_output_aliases={0: 0},                          # update x in place
        compiler_params=pltpu.CompilerParams(dimension_semantics=("parallel",)),
    )(x, g, org)


# ----------------------------------------------------------------------------------
# Losses — tiny [B, num_classes] tensors; plain XLA (no Pallas launch overhead)
# ----------------------------------------------------------------------------------
def cross_entropy_none(logits, targets):
    """torch.nn.CrossEntropyLoss(reduction='none')."""
    logp = jax.nn.log_softmax(logits, axis=1)
    onehot = jax.nn.one_hot(targets, logits.shape[1], dtype=logits.dtype)
    return -jnp.sum(onehot * logp, axis=1)


def cw_loss(logits, targets, margin=50.0):
    # TODO(synk): the PyTorch code builds CWLoss(40) (num_classes=40, default margin 50);
    # we use the actual class count of the logits and mask the target class with -inf.
    num_classes = logits.shape[1]
    onehot = jax.nn.one_hot(targets, num_classes, dtype=logits.dtype)
    self_loss = jnp.sum(onehot * logits, axis=1)
    other_loss = jnp.max(jnp.where(onehot > 0, -jnp.inf, logits), axis=1)
    loss = -jnp.sum(jnp.maximum(self_loss - other_loss + margin, 0.0))
    return loss / logits.shape[0]


def cost_matrix_cos(x, y, eps=1e-6):
    dot = jnp.dot(x, y.T)
    nx = jnp.sqrt(jnp.sum(x * x, axis=1, keepdims=True))
    ny = jnp.sqrt(jnp.sum(y * y, axis=1, keepdims=True))
    cos = dot / jnp.maximum(nx * ny.T, eps)
    return jnp.maximum(1.0 - cos, 0.0)


def sinkhorn_loss_joint_ipot(x_feature, y_feature, epsilon=0.01, niter=20):
    """ot.sinkhorn_loss_joint_IPOT: cosine cost + log-domain Sinkhorn, loss = sum(T * C)."""
    C = cost_matrix_cos(x_feature, y_feature)
    m, n = C.shape
    mu = jnp.full((m,), 1.0 / m, jnp.float32)
    nu = jnp.full((n,), 1.0 / n, jnp.float32)

    def M(u, v):
        return (-C + u[:, None] + v[None, :]) / epsilon

    def lse(A):                                   # numerically stable logsumexp(+1e-6)
        amax = jnp.max(A, axis=1, keepdims=True)
        return jnp.log(jnp.sum(jnp.exp(A - amax), axis=1) + 1e-6) + amax[:, 0]

    u = jnp.zeros((m,), jnp.float32)
    v = jnp.zeros((n,), jnp.float32)
    # TODO(synk): reference early-stops on ||u - u_prev||_1 < 0.1; fixed iteration count here.
    for _ in range(niter):
        u = epsilon * (jnp.log(mu) - lse(M(u, v))) + u
        v = epsilon * (jnp.log(nu) - lse(M(u, v).T)) + v
    T = jnp.exp(M(u, v))
    return jnp.sum(T * C)


# ----------------------------------------------------------------------------------
# Parameter padding (lane-dense hidden / class dims, bf16 weights, f32 biases)
# ----------------------------------------------------------------------------------
def prepare_params(params):
    w1, b1, w2, b2 = params["w1"], params["b1"], params["w2"], params["b2"]
    D, H = w1.shape
    C = w2.shape[1]
    Dp = _round_up(D, _K_TILE)
    Hp = _round_up(H, _LANE)
    Cp = _round_up(C, _LANE)
    w1p = jnp.zeros((Dp, Hp), jnp.bfloat16).at[:D, :H].set(w1.astype(jnp.bfloat16))
    b1p = jnp.zeros((1, Hp), jnp.float32).at[0, :H].set(b1.astype(jnp.float32))
    w2p = jnp.zeros((Hp, Cp), jnp.bfloat16).at[:H, :C].set(w2.astype(jnp.bfloat16))
    b2p = jnp.zeros((1, Cp), jnp.float32).at[0, :C].set(b2.astype(jnp.float32))
    return {"w1": w1p, "b1": b1p, "w2": w2p, "b2": b2p}


# ----------------------------------------------------------------------------------
# Attack implementation (single jitted function: fwd + fori_loop(grad + PGD) + losses)
# ----------------------------------------------------------------------------------
def _infer_impl(pp, inputs, *, num_classes):
    B = inputs.shape[0]
    D = math.prod(inputs.shape[1:])
    Dp = pp["w1"].shape[0]
    xf = jnp.pad(inputs.reshape(B, D).astype(jnp.float32), ((0, 0), (0, Dp - D)))
    return _mlp_logits(pp, xf, num_classes)


def _attack_impl(pp, inputs, targets, key, *, num_classes, num_steps, step_size, epsilon):
    B = inputs.shape[0]
    D = math.prod(inputs.shape[1:])
    Dp = pp["w1"].shape[0]

    xf_org = jnp.pad(inputs.reshape(B, D).astype(jnp.float32), ((0, 0), (0, Dp - D)))

    # natural logits (aux_net(inputs))
    logits_pred_nat = _mlp_logits(pp, xf_org, num_classes)

    # mirror the (unused) reference computations; DCE'd under jit
    _targets_prob = jax.nn.softmax(logits_pred_nat, axis=0)   # dim=0 as in the reference
    _y_gt = jax.nn.one_hot(targets, num_classes, dtype=jnp.float32)

    # random start (the reference does not clamp before the first gradient step)
    noise = jax.random.uniform(key, (B, D), jnp.float32, minval=-epsilon, maxval=epsilon)
    x = xf_org + jnp.pad(noise, ((0, 0), (0, Dp - D)))

    def adv_loss_fn(x_flat):
        logits_pred = _mlp_logits(pp, x_flat, num_classes)
        ot_loss = sinkhorn_loss_joint_ipot(logits_pred_nat, logits_pred, epsilon=0.01)
        loss = jnp.mean(cross_entropy_none(logits_pred, targets))
        loss1 = cw_loss(logits_pred, targets)
        return ot_loss + loss + loss1

    grad_fn = jax.grad(adv_loss_fn)

    def body(_, x_cur):
        g = grad_fn(x_cur)
        return pgd_step_pallas(x_cur, g, xf_org, step_size, epsilon)

    x = jax.lax.fori_loop(0, num_steps, body, x)

    # final forward through basic_net (same params as aux_net)
    logits_pred = _mlp_logits(pp, x, num_classes)
    adv_loss = jnp.mean(cross_entropy_none(logits_pred_nat, targets)
                        + cross_entropy_none(logits_pred, targets))
    x_adv = x[:, :D].reshape(inputs.shape)
    return logits_pred, adv_loss, x_adv


class AttackFeaScatter:
    def __init__(self, params, config):
        self.pp = prepare_params(params)
        self.num_classes = int(params["w2"].shape[1])
        self.rand = config["random_start"]
        self.step_size = float(config["step_size"])
        self.epsilon = float(config["epsilon"])
        self.num_steps = int(config["num_steps"])
        self.ls_factor = float(config.get("ls_factor", 0.1))
        # jit once (hoisted out of __call__); whole attack is a single dispatch
        self._attack_fn = jax.jit(functools.partial(
            _attack_impl, num_classes=self.num_classes, num_steps=self.num_steps,
            step_size=self.step_size, epsilon=self.epsilon))
        self._infer_fn = jax.jit(functools.partial(
            _infer_impl, num_classes=self.num_classes))

    def __call__(self, inputs, targets, key, attack=True):
        if not attack:
            return self._infer_fn(self.pp, inputs), None
        return self._attack_fn(self.pp, inputs, targets, key)


# ----------------------------------------------------------------------------------
# Demo
# ----------------------------------------------------------------------------------
if __name__ == "__main__":
    key = jax.random.PRNGKey(0)
    B, C, H, W = 2, 4, 16, 16
    D = C * H * W
    HIDDEN = 32
    NUM_CLASSES = 10

    k1, k2, k3, k4, k5 = jax.random.split(key, 5)
    params = {
        "w1": jax.random.normal(k1, (D, HIDDEN), jnp.float32) / jnp.sqrt(D),
        "b1": jnp.zeros((HIDDEN,), jnp.float32),
        "w2": jax.random.normal(k2, (HIDDEN, NUM_CLASSES), jnp.float32) / jnp.sqrt(HIDDEN),
        "b2": jnp.zeros((NUM_CLASSES,), jnp.float32),
    }

    inputs = jax.random.uniform(k3, (B, C, H, W), jnp.float32, minval=-1.0, maxval=1.0)
    targets = jax.random.randint(k4, (B,), 0, NUM_CLASSES)

    config = {
        "random_start": True,
        "step_size": 0.007,
        "epsilon": 0.031,
        "num_steps": 3,
        "ls_factor": 0.5,
        "train": True,
        "box_type": "white",
    }

    attack = AttackFeaScatter(params, config)

    logits_clean, none_loss = attack(inputs, targets, k5, attack=False)
    logits_pred, adv_loss, x_adv = attack(inputs, targets, k5, attack=True)
    jax.block_until_ready((logits_clean, logits_pred, adv_loss, x_adv))

    assert none_loss is None
    assert logits_clean.shape == (B, NUM_CLASSES)
    assert logits_pred.shape == (B, NUM_CLASSES)
    assert x_adv.shape == (B, C, H, W)
    assert adv_loss.shape == ()
    assert bool(jnp.all(jnp.isfinite(logits_pred)))
    assert bool(jnp.isfinite(adv_loss))
    assert bool(jnp.all(jnp.abs(x_adv) <= 1.0 + 1e-6))
    print("KERNEL_OK")
</pallas_src>

<mosaic_0001>
module attributes {stable_mosaic.version = 11 : i64} {
  func.func @_mlp_fwd_kernel(%arg0: i32, %arg1: i32, %arg2: memref<16x512xbf16, #tpu.memory_space<vmem>>, %arg3: memref<512x128xbf16, #tpu.memory_space<vmem>>, %arg4: memref<1x128xf32, #tpu.memory_space<vmem>>, %arg5: memref<128x128xbf16, #tpu.memory_space<vmem>>, %arg6: memref<1x128xf32, #tpu.memory_space<vmem>>, %arg7: memref<16x128xf32, #tpu.memory_space<vmem>>, %arg8: memref<16x128xf32, #tpu.memory_space<vmem>>, %arg9: memref<16x128xf32, #tpu.memory_space<vmem>>) attributes {dimension_semantics = [#tpu.dimension_semantics<parallel>, #tpu.dimension_semantics<arbitrary>], iteration_bounds = array<i64: 1, 2>, scalar_prefetch = 0 : i64, scratch_operands = 1 : i64, tpu.core_type = #tpu.core_type<tc>, window_params = [{transform_indices = @transform_0, window_bounds = array<i64: 16, 512>}, {transform_indices = @transform_1, window_bounds = array<i64: 512, 128>}, {pipeline_mode = #tpu.pipeline_mode<synchronous>, transform_indices = @transform_2, window_bounds = array<i64: 1, 128>}, {pipeline_mode = #tpu.pipeline_mode<synchronous>, transform_indices = @transform_3, window_bounds = array<i64: 128, 128>}, {pipeline_mode = #tpu.pipeline_mode<synchronous>, transform_indices = @transform_4, window_bounds = array<i64: 1, 128>}, {transform_indices = @transform_5, window_bounds = array<i64: 16, 128>}, {transform_indices = @transform_6, window_bounds = array<i64: 16, 128>}]} {
    %c0_i32 = arith.constant 0 : i32
    %0 = arith.cmpi eq, %arg1, %c0_i32 : i32
    %1 = arith.extui %0 : i1 to i32
    %c0_i32_0 = arith.constant 0 : i32
    %2 = arith.cmpi ne, %1, %c0_i32_0 : i32
    scf.if %2 {
      %cst_9 = arith.constant 0.000000e+00 : f32
      %12 = vector.broadcast %cst_9 : f32 to vector<16x128xf32>
      %c0_10 = arith.constant 0 : index
      %c0_11 = arith.constant 0 : index
      %13 = vector.load %arg9[%c0_10, %c0_11] : memref<16x128xf32, #tpu.memory_space<vmem>>, vector<16x128xf32>
      tpu.vector_store %arg9[%c0_10, %c0_11], %12 {strides = array<i32>} : memref<16x128xf32, #tpu.memory_space<vmem>>, vector<16x128xf32>,
    } else {
    }
    %c0 = arith.constant 0 : index
    %c0_1 = arith.constant 0 : index
    %3 = vector.load %arg9[%c0, %c0_1] : memref<16x128xf32, #tpu.memory_space<vmem>>, vector<16x128xf32>
    %c0_2 = arith.constant 0 : index
    %c0_3 = arith.constant 0 : index
    %4 = vector.load %arg2[%c0_2, %c0_3] : memref<16x512xbf16, #tpu.memory_space<vmem>>, vector<16x512xbf16>
    %c0_4 = arith.constant 0 : index
    %c0_5 = arith.constant 0 : index
    %5 = vector.load %arg3[%c0_4, %c0_5] : memref<512x128xbf16, #tpu.memory_space<vmem>>, vector<512x128xbf16>
    %cst = arith.constant dense<0.000000e+00> : vector<16x128xf32>
    %6 = tpu.matmul %4, %5, %cst {dimension_numbers = #tpu.dot_dimension_numbers<[1], [0], [0], [1], [0, 0, 1, 1], [], []>} : vector<16x512xbf16>, vector<512x128xbf16>, vector<16x128xf32> -> vector<16x128xf32>
    %7 = arith.addf %3, %6 : vector<16x128xf32>
    %c0_6 = arith.constant 0 : index
    %c0_7 = arith.constant 0 : index
    %8 = vector.load %arg9[%c0_6, %c0_7] : memref<16x128xf32, #tpu.memory_space<vmem>>, vector<16x128xf32>
    tpu.vector_store %arg9[%c0_6, %c0_7], %7 {strides = array<i32>} : memref<16x128xf32, #tpu.memory_space<vmem>>, vector<16x128xf32>,
    %c1_i32 = arith.constant 1 : i32
    %9 = arith.cmpi eq, %arg1, %c1_i32 : i32
    %10 = arith.extui %9 : i1 to i32
    %c0_i32_8 = arith.constant 0 : i32
    %11 = arith.cmpi ne, %10, %c0_i32_8 : i32
    scf.if %11 {
      %c0_9 = arith.constant 0 : index
      %c0_10 = arith.constant 0 : index
      %12 = vector.load %arg9[%c0_9, %c0_10] : memref<16x128xf32, #tpu.memory_space<vmem>>, vector<16x128xf32>
      %c0_11 = arith.constant 0 : index
      %c0_12 = arith.constant 0 : index
      %13 = vector.load %arg4[%c0_11, %c0_12] : memref<1x128xf32, #tpu.memory_space<vmem>>, vector<1x128xf32>
      %14 = vector.broadcast %13 : vector<1x128xf32> to vector<16x128xf32>
      %15 = arith.addf %12, %14 : vector<16x128xf32>
      %c0_13 = arith.constant 0 : index
      %c0_14 = arith.constant 0 : index
      %16 = vector.load %arg8[%c0_13, %c0_14] : memref<16x128xf32, #tpu.memory_space<vmem>>, vector<16x128xf32>
      tpu.vector_store %arg8[%c0_13, %c0_14], %15 {strides = array<i32>} : memref<16x128xf32, #tpu.memory_space<vmem>>, vector<16x128xf32>,
      %cst_15 = arith.constant 0.000000e+00 : f32
      %17 = vector.broadcast %cst_15 : f32 to vector<16x128xf32>
      %18 = arith.maximumf %15, %17 : vector<16x128xf32>
      %19 = arith.truncf %18 : vector<16x128xf32> to vector<16x128xbf16>
      %c0_16 = arith.constant 0 : index
      %c0_17 = arith.constant 0 : index
      %20 = vector.load %arg5[%c0_16, %c0_17] : memref<128x128xbf16, #tpu.memory_space<vmem>>, vector<128x128xbf16>
      %cst_18 = arith.constant dense<0.000000e+00> : vector<16x128xf32>
      %21 = tpu.matmul %19, %20, %cst_18 {dimension_numbers = #tpu.dot_dimension_numbers<[1], [0], [0], [1], [0, 0, 1, 1], [], []>} : vector<16x128xbf16>, vector<128x128xbf16>, vector<16x128xf32> -> vector<16x128xf32>
      %c0_19 = arith.constant 0 : index
      %c0_20 = arith.constant 0 : index
      %22 = vector.load %arg6[%c0_19, %c0_20] : memref<1x128xf32, #tpu.memory_space<vmem>>, vector<1x128xf32>
      %23 = vector.broadcast %22 : vector<1x128xf32> to vector<16x128xf32>
      %24 = arith.addf %21, %23 : vector<16x128xf32>
      %c0_21 = arith.constant 0 : index
      %c0_22 = arith.constant 0 : index
      %25 = vector.load %arg7[%c0_21, %c0_22] : memref<16x128xf32, #tpu.memory_space<vmem>>, vector<16x128xf32>
      tpu.vector_store %arg7[%c0_21, %c0_22], %24 {strides = array<i32>} : memref<16x128xf32, #tpu.memory_space<vmem>>, vector<16x128xf32>,
    } else {
    }
    return
  }
  func.func @transform_0(%arg0: i32, %arg1: i32) -> (i32, i32) {
    %c0_i32 = arith.constant 0 : i32
    return %arg0, %arg1 : i32, i32
  }
  func.func @transform_1(%arg0: i32, %arg1: i32) -> (i32, i32) {
    %c0_i32 = arith.constant 0 : i32
    %c0_i32_0 = arith.constant 0 : i32
    return %arg1, %c0_i32 : i32, i32
  }
  func.func @transform_2(%arg0: i32, %arg1: i32) -> (i32, i32) {
    %c0_i32 = arith.constant 0 : i32
    %c0_i32_0 = arith.constant 0 : i32
    %c0_i32_1 = arith.constant 0 : i32
    return %c0_i32, %c0_i32_0 : i32, i32
  }
  func.func @transform_3(%arg0: i32, %arg1: i32) -> (i32, i32) {
    %c0_i32 = arith.constant 0 : i32
    %c0_i32_0 = arith.constant 0 : i32
    %c0_i32_1 = arith.constant 0 : i32
    return %c0_i32, %c0_i32_0 : i32, i32
  }
  func.func @transform_4(%arg0: i32, %arg1: i32) -> (i32, i32) {
    %c0_i32 = arith.constant 0 : i32
    %c0_i32_0 = arith.constant 0 : i32
    %c0_i32_1 = arith.constant 0 : i32
    return %c0_i32, %c0_i32_0 : i32, i32
  }
  func.func @transform_5(%arg0: i32, %arg1: i32) -> (i32, i32) {
    %c0_i32 = arith.constant 0 : i32
    %c0_i32_0 = arith.constant 0 : i32
    return %arg0, %c0_i32 : i32, i32
  }
  func.func @transform_6(%arg0: i32, %arg1: i32) -> (i32, i32) {
    %c0_i32 = arith.constant 0 : i32
    %c0_i32_0 = arith.constant 0 : i32
    return %arg0, %c0_i32 : i32, i32
  }
}

</mosaic_0001>

<bundles_post_ra>
// kernel: _infer_impl.1
= control target key start
LH: loop header
LB: loop body
LE: loop exit
PB: predicated region body
PF: predicated region fallthrough
CT: control target
= control target key end

     0   :  { %12 = vsyncpa [#allocation5], 0  ;;  %s1560_s0 = inlined_call_operand.vmem [shape: bf16[16,1024], index: 0, kind: input, shape index: {}]   ;;  %s1561_s1 = inlined_call_operand.hbm [shape: bf16[1024,128], index: 1, kind: input, shape index: {}]   ;;  %s1562_s2 = inlined_call_operand.vmem [shape: f32[1,128], index: 2, kind: input, shape index: {}]   ;;  %s1563_s3 = inlined_call_operand.vmem [shape: bf16[128,128], index: 3, kind: input, shape index: {}]   ;;  %s1564_s4 = inlined_call_operand.vmem [shape: f32[1,128], index: 4, kind: input, shape index: {}]   ;;  %s1565_s5 = inlined_call_operand.vmem [shape: f32[16,128], index: 5, kind: output, shape index: {0}]   ;;  %s1566_s6 = inlined_call_operand.hbm [shape: f32[16,128], index: 6, kind: output, shape index: {1}]  }
   0x1   :  { %14 = vsyncpa [#allocation5 + $0x1], 0 }
   0x2   :  { %15 = vsyncpa [#allocation6], 0  ;;  %s1381_s21 = smov 0   ;;  %s1383_s22 = smov 0  }
   0x3   :  { %s1385_s23 = smov 0   ;;  %s1387_s24 = smov 0  }
   0x4   :  { %s1389_s25 = smov 0   ;;  %s1391_s26 = smov 0  }
   0x5 LB: > { %s922_s27 = sadd.s32 4294967295, %s1338_s26   ;;  %s30_s28 = sadd.s32 1, %s1334_s25  ;;  %s1338_s26 = sphi %s1391_s26, %s21_s26   ;;  %s1334_s25 = sphi %s1389_s25, %s1573_s25   ;;  %s1330_s24 = sphi %s1387_s24, %s1572_s24   ;;  %s1326_s23 = sphi %s1385_s23, %s1571_s23   ;;  %s1322_s22 = sphi %s1383_s22, %s1570_s22   ;;  %s1318_s21 = sphi %s1381_s21, %s1569_s21  }
   0x6   : > { %p31_p0 = scmp.ge.s32.totalorder %s30_s28, 2  ;;  %s42_s29 = sadd.s32 1, %s1326_s23 }
   0x7   : > { %p49_p1 = scmp.ne.s32.totalorder %s1326_s23, %s1322_s22  ;;  %p50_p2 = scmp.eq.s32.totalorder %s1338_s26, 0 }
   0x8   : > { %s1575_s28 = smov (%p31_p0, %s30_s28), 0  ;;  %p81_p4 = scmp.ne.s32.totalorder %s1322_s22, %s1318_s21 }
   0x9   : > { %p1417_p3 = por %p50_p2, %p49_p1  ;;  %s38_s7 = ssub.s32 %s1334_s25, %s1575_s28 }
   0xa   : > { %p82_p5 = scmp.eq.s32.totalorder %s922_s27, 0  ;;  %p40_p6 = scmp.eq.s32.totalorder %s38_s7, 0 }
   0xb   : > { %p924_p8 = scmp.ge.s32.totalorder %s1338_s26, 2 }
   0xc   : > { %p1426_p7 = por %p82_p5, %p81_p4 }
   0xd   : > { %s1431_s9 = scalar_select %p40_p6, %s1326_s23, %s42_s29  }
   0xe   : > { %225 = sbr.rel (%p924_p8) target bundleno = 33 (0x21), region = 28 }
  0x13   : > { %228 = sbr.rel (!%p1417_p3) target bundleno = 27 (0x1b), region = 32  ;;  %s230_s10 = sand.u32 (%p1417_p3), 1, %s1326_s23  }
  0x14   : > { %s1118_s11 = sshll.u32 (%p1417_p3), %s1334_s25, 4  ;;  %s925_s12 = sshll.u32 (%p1417_p3), %s230_s10, 5 }
  0x15   : > { %s238_s15 = scalar_lea.vmem (%p1417_p3), %s1560_s0, %s1118_s11  ;;  %s232_s16 = scalar_lea.vmem (%p1417_p3), [#allocation3], %s925_s12 }
  0x16   : > { %v251_v0 = vld [vmem:[%s238_s15] sm:$0xff] (%p1417_p3)  ;;  %v253_v1 = vld [vmem:[%s238_s15 + $0x8] sm:$0xff] (%p1417_p3) }
  0x17   : > { %v255_v2 = vld [vmem:[%s238_s15 + $0x20] sm:$0xff] (%p1417_p3)  ;;  %252 = vst [vmem:[%s232_s16] sm:$0xff] (%p1417_p3), %v251_v0  ;;  %v257_v3 = vld [vmem:[%s238_s15 + $0x28] sm:$0xff] (%p1417_p3) }
  0x18   : > { %254 = vst [vmem:[%s232_s16 + $0x8] sm:$0xff] %v253_v1 }
  0x19   : > { %256 = vst [vmem:[%s232_s16 + $0x10] sm:$0xff] %v255_v2 }
  0x1a   : > { %258 = vst [vmem:[%s232_s16 + $0x18] sm:$0xff] %v257_v3 }
  0x1b PF: > { %s265_s17 = sand.u32 1, %s1326_s23   ;;  %s1119_s18 = sshll.u32 %s1334_s25, 8 }
  0x1c   : > { %s928_s19 = sshll.u32 %s265_s17, 8  ;;  %s274_s29 = scalar_lea.hbm %s1561_s1, %s1119_s18 }
  0x1d   : > { %s275_s7 = sshll.u32 %s274_s29, 4  ;;  %s269_s10 = scalar_lea.vmem [#allocation4], %s928_s19  ;;  %s276_s7 = int_to_ptr.hbm [resolvable:$true] %s275_s7 }
  0x1e   : > { %s277_s11 = sshll.u32 %s269_s10, 4  ;;  %s266_s12 = scalar_lea.sflag [#allocation5], %s265_s17  ;;  %s278_s11 = int_to_ptr.vmem [resolvable:$true] %s277_s11 }
  0x1f   : > { %s1340_s13 = smov 64   ;;  %s1341_s14 = smov 4  }
  0x20   : > { %1164 = dma.hbm_to_vmem [thread:$0]  (%p1417_p3), %s276_s7, 4096, %s278_s11, %s266_s12, %s1340_s13, %s1340_s13, %s1341_s14  }
  0x21 PF: > { %p931_p9 = scmp.ge.s32.totalorder %s1338_s26, 1  ;;  %p285_p10 = scmp.lt.s32.totalorder %s1338_s26, 3 }
  0x23   : > { %p286_p11 = pnand %p931_p9, %p285_p10 }
  0x24   : > { %s292_s15 = sand.u32 (!%p286_p11), 1, %s1322_s22  }
  0x25   : > { %289 = sbr.rel (%p286_p11) target bundleno = 409 (0x199), region = 59  ;;  %s932_s16 = sshll.u32 (!%p286_p11), %s292_s15, 5 }
  0x26   : > { %s933_s18 = sshll.u32 (!%p286_p11), %s292_s15, 8  ;;  %s1451_s19 = scalar_lea.vmem (!%p286_p11), [#allocation3], %s932_s16 }
  0x27   : > { %s299_s20 = scalar_lea.sflag (!%p286_p11), [#allocation5], %s292_s15  ;;  %s1453_s17 = scalar_lea.vmem (!%p286_p11), [#allocation4], %s933_s18 }
  0x2a   : > { %1309 = dma.done.wait (%p1426_p7), %s299_s20, 4096  }
  0x2b   : > { %1311 = vsyncadd (%p1426_p7), %s299_s20, 4294963200  ;;  %p934_p12 = scmp.ne.s32.totalorder %s1330_s24, 0 }
  0x2d   : > { %349 = sbr.rel (%p934_p12) target bundleno = 53 (0x35), region = 71 }
  0x32   : > { %v1342_v4 = vmov 0.0  }
  0x33   : > { %350 = vst [vmem:[#allocation2] sm:$0xff] %v1342_v4 }
  0x34   : > { %351 = vst [vmem:[#allocation2 + $0x8] sm:$0xff] %v1342_v4 }
  0x35 PF: > { %v1131_v5 = vld [vmem:[%s1453_s17 + $0x38] sm:$0xff]  ;;  %v1130_v9 = vld [vmem:[%s1453_s17 + $0x30] sm:$0xff]  ;;  %v1129_v13 = vld [vmem:[%s1453_s17 + $0x28] sm:$0xff]  ;;  %p1079_p13 = scmp.ne.s32.totalorder %s1330_s24, 1 }
  0x36   : > { %v1139_v6 = vld [vmem:[%s1453_s17 + $0x78] sm:$0xff]  ;;  %634 = vmatpush.bf16.msra.mxu0 %v1131_v5  ;;  %v1138_v10 = vld [vmem:[%s1453_s17 + $0x70] sm:$0xff]  ;;  %v1137_v14 = vld [vmem:[%s1453_s17 + $0x68] sm:$0xff] }
  0x37   : > { %v1147_v7 = vld [vmem:[%s1453_s17 + $0xb8] sm:$0xff]  ;;  %648 = vmatpush.bf16.msra.mxu1 %v1139_v6  ;;  %v1146_v11 = vld [vmem:[%s1453_s17 + $0xb0] sm:$0xff]  ;;  %v1145_v15 = vld [vmem:[%s1453_s17 + $0xa8] sm:$0xff] }
  0x38   : > { %v1155_v8 = vld [vmem:[%s1453_s17 + $0xf8] sm:$0xff]  ;;  %662 = vmatpush.bf16.msra.mxu2 %v1147_v7  ;;  %v1154_v12 = vld [vmem:[%s1453_s17 + $0xf0] sm:$0xff]  ;;  %v1153_v16 = vld [vmem:[%s1453_s17 + $0xe8] sm:$0xff] }
  0x39   : > { %676 = vmatpush.bf16.msra.mxu3 %v1155_v8  ;;  %v1128_v17 = vld [vmem:[%s1453_s17 + $0x20] sm:$0xff]  ;;  %v1127_v21 = vld [vmem:[%s1453_s17 + $0x18] sm:$0xff]  ;;  %v1126_v25 = vld [vmem:[%s1453_s17 + $0x10] sm:$0xff] }
  0x3a   : > { %635 = vmatpush.bf16.msra.mxu0 %v1130_v9  ;;  %v1136_v18 = vld [vmem:[%s1453_s17 + $0x60] sm:$0xff]  ;;  %v1135_v22 = vld [vmem:[%s1453_s17 + $0x58] sm:$0xff]  ;;  %v1134_v26 = vld [vmem:[%s1453_s17 + $0x50] sm:$0xff] }
  0x3b   : > { %649 = vmatpush.bf16.msra.mxu1 %v1138_v10  ;;  %v1144_v19 = vld [vmem:[%s1453_s17 + $0xa0] sm:$0xff]  ;;  %v1143_v23 = vld [vmem:[%s1453_s17 + $0x98] sm:$0xff]  ;;  %v1142_v27 = vld [vmem:[%s1453_s17 + $0x90] sm:$0xff] }
  0x3c   : > { %663 = vmatpush.bf16.msra.mxu2 %v1146_v11  ;;  %v1152_v20 = vld [vmem:[%s1453_s17 + $0xe0] sm:$0xff]  ;;  %v1151_v24 = vld [vmem:[%s1453_s17 + $0xd8] sm:$0xff]  ;;  %v1150_v28 = vld [vmem:[%s1453_s17 + $0xd0] sm:$0xff] }
  0x3d   : > { %677 = vmatpush.bf16.msra.mxu3 %v1154_v12  ;;  %v1125_v29 = vld [vmem:[%s1453_s17 + $0x8] sm:$0xff]  ;;  %v1124_v33 = vld [vmem:[%s1453_s17] sm:$0xff]  ;;  %v1122_v38 = vld [vmem:[%s1451_s19 + $0xc] sm:$0xf0] }
  0x3e   : > { %636 = vmatpush.bf16.msra.mxu0 %v1129_v13  ;;  %v1133_v30 = vld [vmem:[%s1453_s17 + $0x48] sm:$0xff]  ;;  %v1132_v34 = vld [vmem:[%s1453_s17 + $0x40] sm:$0xff]  ;;  %v939_v40 = vld [vmem:[%s1451_s19 + $0x10] sm:$0xf0] }
  0x3f   : > { %650 = vmatpush.bf16.msra.mxu1 %v1137_v14  ;;  %v1141_v31 = vld [vmem:[%s1453_s17 + $0x88] sm:$0xff]  ;;  %v1140_v35 = vld [vmem:[%s1453_s17 + $0x80] sm:$0xff]  ;;  %v1123_v42 = vld [vmem:[%s1451_s19 + $0x14] sm:$0xf0] }
  0x40   : > { %664 = vmatpush.bf16.msra.mxu2 %v1145_v15  ;;  %v1149_v32 = vld [vmem:[%s1453_s17 + $0xc8] sm:$0xff]  ;;  %v1148_v36 = vld [vmem:[%s1453_s17 + $0xc0] sm:$0xff]  ;;  %v947_v44 = vld [vmem:[%s1451_s19 + $0x18] sm:$0xf0] }
  0x41   : > { %678 = vmatpush.bf16.msra.mxu3 %v1153_v16  ;;  %v937_v37 = vld [vmem:[%s1451_s19] sm:$0xf]  ;;  %v1120_v39 = vld [vmem:[%s1451_s19 + $0x4] sm:$0xf]  ;;  %v945_v41 = vld [vmem:[%s1451_s19 + $0x8] sm:$0xf] }
  0x42   : > { %637 = vmatpush.bf16.msra.mxu0 %v1128_v17  ;;  %v1121_v43 = vld [vmem:[%s1451_s19 + $0xc] sm:$0xf]  ;;  %v938_v45 = vor.u32 %v1122_v38, %v937_v37  ;;  %v942_v46 = vor.u32 %v1120_v39, %v939_v40  ;;  %v946_v47 = vor.u32 %v1123_v42, %v945_v41  ;;  %v352_v55 = vld [vmem:[#allocation2] sm:$0xff]  ;;  %v353_v63 = vld [vmem:[#allocation2 + $0x8] sm:$0xff] }
  0x43   : > { %651 = vmatpush.bf16.msra.mxu1 %v1136_v18  ;;  %v950_v48 = vor.u32 %v1121_v43, %v947_v44 }
  0x44   : > { %665 = vmatpush.bf16.msra.mxu2 %v1144_v19 }
  0x45   : > { %679 = vmatpush.bf16.msra.mxu3 %v1152_v20 }
  0x46   : > { %638 = vmatpush.bf16.msra.mxu0 %v1127_v21 }
  0x47   : > { %652 = vmatpush.bf16.msra.mxu1 %v1135_v22 }
  0x48   : > { %666 = vmatpush.bf16.msra.mxu2 %v1143_v23 }
  0x49   : > { %680 = vmatpush.bf16.msra.mxu3 %v1151_v24 }
  0x4a   : > { %639 = vmatpush.bf16.msra.mxu0 %v1126_v25 }
  0x4b   : > { %653 = vmatpush.bf16.msra.mxu1 %v1134_v26 }
  0x4c   : > { %667 = vmatpush.bf16.msra.mxu2 %v1142_v27 }
  0x4d   : > { %681 = vmatpush.bf16.msra.mxu3 %v1150_v28 }
  0x4e   : > { %640 = vmatpush.bf16.msra.mxu0 %v1125_v29 }
  0x4f   : > { %654 = vmatpush.bf16.msra.mxu1 %v1133_v30 }
  0x50   : > { %668 = vmatpush.bf16.msra.mxu2 %v1141_v31 }
  0x51   : > { %682 = vmatpush.bf16.msra.mxu3 %v1149_v32 }
  0x52   : > { %641 = vmatpush.bf16.msra.mxu0 %v1124_v33 }
  0x53   : > { %655 = vmatpush.bf16.msra.mxu1 %v1132_v34 }
  0x54   : > { %669 = vmatpush.bf16.msra.mxu2 %v1140_v35 }
  0x55   : > { %683 = vmatpush.bf16.msra.mxu3 %v1148_v36  ;;  %642 = vmatmul.bf16.vlgmr.msra.gmra.mxu0 %v938_v45 }
  0x56   : > { %656 = vmatmul.bf16.vlgmr.msra.gmra.mxu1 %v942_v46 }
  0x57   : > { %670 = vmatmul.bf16.vlgmr.msra.gmra.mxu2 %v946_v47 }
  0x58   : > { %684 = vmatmul.bf16.vlgmr.msra.gmra.mxu3 %v950_v48 }
  0xd2   : > { %v643_v49 = vpop.f32.mrf.mxu0 }
  0xd3   : > { %v657_v50 = vpop.f32.mrf.mxu1 }
  0xd4   : > { %v658_v51 = vadd.f32 %v657_v50, %v643_v49 }
  0xda   : > { %v671_v52 = vpop.f32.mrf.mxu2  ;;  %v645_v57 = vpop.f32.mrf.mxu0 }
  0xdb   : > { %v685_v53 = vpop.f32.mrf.mxu3  ;;  %v672_v54 = vadd.f32 %v671_v52, %v658_v51  ;;  %v659_v58 = vpop.f32.mrf.mxu1 }
  0xdc   : > { %v660_v60 = vadd.f32 %v659_v58, %v645_v57 }
  0xdd   : > { %v686_v56 = vadd.f32 %v685_v53, %v672_v54 }
  0xdf   : > { %v690_v59 = vadd.f32 %v686_v56, %v352_v55 }
  0xe1   : > { %692 = vst [vmem:[#allocation2] sm:$0xff] %v690_v59 }
  0xe2   : > { %v673_v61 = vpop.f32.mrf.mxu2 }
  0xe3   : > { %v674_v62 = vadd.f32 %v673_v61, %v660_v60  ;;  %v687_v0 = vpop.f32.mrf.mxu3 }
  0xe5   : > { %v688_v1 = vadd.f32 %v687_v0, %v674_v62  ;;  %697 = sbr.rel (%p1079_p13) target bundleno = 403 (0x193), region = 75 }
  0xe7   : > { %v691_v2 = vadd.f32 %v688_v1, %v353_v63 }
  0xe9   : > { %693 = vst [vmem:[#allocation2 + $0x8] sm:$0xff] %v691_v2 }
  0xea   : > { %v1163_v3 = vld [vmem:[%s1563_s3 + $0x38] sm:$0xff]  ;;  %v1162_v4 = vld [vmem:[%s1563_s3 + $0x30] sm:$0xff]  ;;  %v698_v5 = vld [vmem:[#allocation2] sm:$0xff] }
  0xeb   : > { %779 = vmatpush.bf16.msra.mxu0 %v1163_v3  ;;  %v1226_v7 = vld [vmem:[%s1562_s2] ss:$0 sm:$0xff]  ;;  %v1161_v9 = vld [vmem:[%s1563_s3 + $0x28] sm:$0xff]  ;;  %v1159_v12 = vld [vmem:[%s1563_s3 + $0x18] sm:$0xff] }
  0xec   : > { %v704_v8 = vadd.f32 %v1226_v7, %v698_v5  ;;  %v1160_v11 = vld [vmem:[%s1563_s3 + $0x20] sm:$0xff]  ;;  %v1158_v13 = vld [vmem:[%s1563_s3 + $0x10] sm:$0xff]  ;;  %v1157_v14 = vld [vmem:[%s1563_s3 + $0x8] sm:$0xff] }
  0xed   : > { %v1156_v17 = vld [vmem:[%s1563_s3] sm:$0xff] }
  0xee   : > { %706 = vst [vmem:[#allocation7] sm:$0xff] %v704_v8  ;;  %v708_v15 = vmax.f32 %v704_v8, 0.0  ;;  %v1227_v19 = vld [vmem:[%s1564_s4] ss:$0 sm:$0xff] }
  0xef   : > { %780 = vmatpush.bf16.msra.mxu0 %v1162_v4 }
  0xf0   : > { %v699_v6 = vld [vmem:[#allocation2 + $0x8] sm:$0xff] }
  0xf1   : > { %v705_v10 = vadd.f32 %v1226_v7, %v699_v6 }
  0xf3   : > { %707 = vst [vmem:[#allocation7 + $0x8] sm:$0xff] %v705_v10  ;;  %781 = vmatpush.bf16.msra.mxu0 %v1161_v9  ;;  %v709_v16 = vmax.f32 %v705_v10, 0.0 }
  0xf5   : > { %v710_v18 = vpack.c.bf16 %v709_v16, %v708_v15 }
  0xf7   : > { %782 = vmatpush.bf16.msra.mxu0 %v1160_v11 }
  0xfb   : > { %783 = vmatpush.bf16.msra.mxu0 %v1159_v12 }
  0xff   : > { %784 = vmatpush.bf16.msra.mxu0 %v1158_v13 }
 0x103   : > { %785 = vmatpush.bf16.msra.mxu0 %v1157_v14 }
 0x107   : > { %786 = vmatpush.bf16.msra.mxu0 %v1156_v17 }
 0x10a   : > { %787 = vmatmul.bf16.vlgmr.msra.gmra.mxu0 %v710_v18 }
 0x187   : > { %v788_v20 = vpop.f32.mrf.mxu0 }
 0x188   : > { %v789_v21 = vadd.f32 %v1227_v19, %v788_v20 }
 0x18a   : > { %793 = vst [vmem:[%s1565_s5] sm:$0xff] %v789_v21 }
 0x18f   : > { %v790_v22 = vpop.f32.mrf.mxu0 }
 0x190   : > { %v791_v23 = vadd.f32 %v1227_v19, %v790_v22 }
 0x192   : > { %794 = vst [vmem:[%s1565_s5 + $0x8] sm:$0xff] %v791_v23 }
 0x193 PF: > { %p1170_p0 = scmp.eq.s32.totalorder %s922_s27, 1  ;;  %s814_s13 = sshll.u32 %s1566_s6, 4  ;;  %s815_s13 = int_to_ptr.hbm [resolvable:$true] %s814_s13 }
 0x194   : > { %s1343_s14 = smov [#allocation7]   ;;  %s1344_s16 = smov 128  }
 0x195   : > { %s812_s15 = sshll.u32 %s1343_s14, 4  ;;  %s1345_s18 = smov 8   ;;  %s813_s15 = int_to_ptr.vmem [resolvable:$true] %s812_s15 }
 0x196   : > { %1167 = dma.vmem_to_hbm [thread:$0]  (%p1170_p0), %s813_s15, 256, %s815_s13, [#allocation6], %s1344_s16, %s1344_s16, %s1345_s18  }
 0x197   : > { %1313 = dma.done.wait (%p1170_p0), [#allocation6], 256  }
 0x198   : > { %1315 = vsyncadd (%p1170_p0), [#allocation6], 4294967040 }
 0x199 PF: > { %s21_s26 = sadd.s32 1, %s1338_s26   ;;  %s1569_s21 = smov %s1322_s22 }
 0x19a   : > { %p18_p1 = scmp.ge.s32.totalorder %s21_s26, 4   ;;  %s1570_s22 = smov %s1326_s23 }
 0x19b   : > { %s1571_s23 = smov %s1431_s9  ;;  %s1572_s24 = smov %s1334_s25 }
 0x19c   : > { %s1573_s25 = smov %s1575_s28  ;;  %20 = sbr.rel (!%p18_p1) target bundleno = 5 (0x5), region = 129 }
 0x1a1   :  { %839 = vsyncpa [#allocation5], 1 }
 0x1a2   :  { %841 = vsyncpa [#allocation5 + $0x1], 1 }
 0x1a3   :  { %842 = vsyncpa [#allocation6], 1 }
 0x1a4   :  { %844 = vsyncpa [#allocation6 + $0x1], 1 }

</bundles_post_ra>
